<compile_context>
chip_gen: v7x
topology: tpu7x:2x2x1
jax: 0.10.0
libtpu: 0.0.40
codegen_flags: <defaults>
</compile_context>

<pallas_src>
import jax
import jax.numpy as jnp
from jax.experimental import pallas as pl
from jax.experimental.pallas import tpu as pltpu


# ------------------------------------------------------------- fused kernel
def _make_fused_kernel(inv_hw):
    def fused_kernel(x_ref, w_ref, b_ref, o_ref):
        # x_ref: (C, HW); w_ref: (C_out, C_in); b_ref: (C_out, 1) f32.
        x = x_ref[...]
        # f32 channel means (C, 1); lane reduction keeps channels on sublanes.
        pooled = jnp.sum(x, axis=-1, keepdims=True, dtype=jnp.float32) * inv_hw
        # 1x1 conv == matvec: (C_out, C_in) @ (C_in, 1), f32 accumulation.
        logits = jnp.dot(w_ref[...], pooled.astype(w_ref.dtype),
                         preferred_element_type=jnp.float32) + b_ref[...]
        att = jax.nn.sigmoid(logits)                       # (C, 1) f32
        o_ref[...] = (x * att.astype(x.dtype)).astype(o_ref.dtype)

    return fused_kernel


# ---------------------------------------------- fallback pass 1: pool+excite
def _make_pool_excite_kernel(hw, thw, n_hw, inv_hw):
    need_mask = (hw % thw) != 0
    rem = hw - (n_hw - 1) * thw       # valid lanes in the final (partial) tile

    def kernel(x_ref, w_ref, b_ref, att_ref, sum_ref):
        # x_ref: (C, thw) tile; w_ref: (C_out, C_in); b_ref: (C, 1) f32
        # att_ref: (C, 1) f32 output (resident across k); sum_ref: (C, 1) f32
        k = pl.program_id(1)

        @pl.when(k == 0)
        def _():
            sum_ref[...] = jnp.zeros_like(sum_ref)

        if need_mask:
            # Plain unmasked sum for all full tiles; mask only the last one.
            @pl.when(k < n_hw - 1)
            def _():
                sum_ref[...] += jnp.sum(x_ref[...], axis=-1, keepdims=True,
                                        dtype=jnp.float32)

            @pl.when(k == n_hw - 1)
            def _():
                x = x_ref[...]
                pos = jax.lax.broadcasted_iota(jnp.int32, x.shape, 1)
                x = jnp.where(pos < rem, x, jnp.zeros_like(x))
                sum_ref[...] += jnp.sum(x, axis=-1, keepdims=True,
                                        dtype=jnp.float32)
        else:
            sum_ref[...] += jnp.sum(x_ref[...], axis=-1, keepdims=True,
                                    dtype=jnp.float32)

        # Excite folded into the last tile of the pool pass (no extra launch).
        @pl.when(k == n_hw - 1)
        def _():
            pooled = sum_ref[...] * inv_hw
            logits = jnp.dot(w_ref[...], pooled.astype(w_ref.dtype),
                             preferred_element_type=jnp.float32) + b_ref[...]
            att_ref[...] = jax.nn.sigmoid(logits)

    return kernel


# --------------------------------------------------- fallback pass 2: scale
def _scale_kernel(x_ref, att_ref, o_ref):
    # x_ref: (C, thw); att_ref: (C, 1) f32; multiply in the input dtype.
    o_ref[...] = (x_ref[...] * att_ref[...].astype(x_ref.dtype)).astype(o_ref.dtype)


# ------------------------------------------------------------------ budgets
def _vmem_capacity_bytes():
    try:
        cap = int(pltpu.get_tpu_info().vmem_capacity_bytes)
        if cap > 0:
            return cap
    except Exception:
        pass
    return 64 << 20          # conservative default (v7x per-core VMEM)


def _vmem_limit(nbytes, cap):
    # >= 8 MiB headroom over hand-counted buffers (Mosaic scratch, semaphores).
    return int(min(max(nbytes + (8 << 20), 16 << 20), cap - (2 << 20)))


# ------------------------------------------------------------------- wrapper
def se_block(x, weight, bias):
    """x: (N, C, H, W); weight: (C, C, 1, 1); bias: (C,) -> (N, C, H, W)"""
    N, C, H, W = x.shape
    HW = H * W
    itemsize = jnp.dtype(x.dtype).itemsize

    x_flat = x.reshape(N, C, HW)
    w2d = weight[:, :, 0, 0]                       # (C_out, C_in), native dtype
    b_col = bias.reshape(C, 1).astype(jnp.float32)
    w_bytes = C * C * jnp.dtype(w2d.dtype).itemsize
    inv_hw = 1.0 / float(HW)

    cap = _vmem_capacity_bytes()
    budget = (cap * 5) // 8          # ~40 MiB on v7x, ~80 MiB on v5e/v6e

    # ---- fused single pass: one HBM read + one HBM write of x --------------
    fused_bytes = 4 * C * HW * itemsize + 2 * w_bytes + 4 * C * 4
    if fused_bytes <= budget:
        out_flat = pl.pallas_call(
            _make_fused_kernel(inv_hw),
            out_shape=jax.ShapeDtypeStruct((N, C, HW), x.dtype),
            grid_spec=pltpu.PrefetchScalarGridSpec(
                num_scalar_prefetch=0,
                grid=(N,),
                in_specs=[
                    pl.BlockSpec((pl.Squeezed(), C, HW), lambda n: (n, 0, 0)),
                    pl.BlockSpec((C, C), lambda n: (0, 0)),
                    pl.BlockSpec((C, 1), lambda n: (0, 0)),
                ],
                out_specs=pl.BlockSpec((pl.Squeezed(), C, HW),
                                       lambda n: (n, 0, 0)),
            ),
            compiler_params=pltpu.CompilerParams(
                dimension_semantics=("parallel",),
                vmem_limit_bytes=_vmem_limit(fused_bytes, cap),
            ),
        )(x_flat, w2d, b_col)
        return out_flat.reshape(N, C, H, W)

    # ---- fallback: two streamed passes for oversized images ----------------
    # Byte-targeted, lane-aligned HW tile: 4 x-sized buffers (scale pass) plus
    # the resident weight must fit the budget.
    avail = max(budget - 2 * w_bytes - (4 << 20), 4 << 20)
    thw = (avail // (4 * C * itemsize)) // 128 * 128
    thw = int(max(128, thw))
    if thw >= HW:
        thw = HW
    n_hw = pl.cdiv(HW, thw)
    tile_bytes = C * thw * itemsize

    # pass 1: pool (f32 accumulate) + excite at the last tile -> att (N, C, 1)
    pool_bytes = 2 * tile_bytes + 2 * w_bytes + 5 * C * 4
    att = pl.pallas_call(
        _make_pool_excite_kernel(HW, thw, n_hw, inv_hw),
        out_shape=jax.ShapeDtypeStruct((N, C, 1), jnp.float32),
        grid_spec=pltpu.PrefetchScalarGridSpec(
            num_scalar_prefetch=0,
            grid=(N, n_hw),
            in_specs=[
                pl.BlockSpec((pl.Squeezed(), C, thw), lambda n, k: (n, 0, k)),
                pl.BlockSpec((C, C), lambda n, k: (0, 0)),
                pl.BlockSpec((C, 1), lambda n, k: (0, 0)),
            ],
            out_specs=pl.BlockSpec((pl.Squeezed(), C, 1),
                                   lambda n, k: (n, 0, 0)),
            scratch_shapes=[pltpu.VMEM((C, 1), jnp.float32)],
        ),
        compiler_params=pltpu.CompilerParams(
            dimension_semantics=("parallel", "arbitrary"),
            vmem_limit_bytes=_vmem_limit(pool_bytes, cap),
        ),
    )(x_flat, w2d, b_col)

    # pass 2: elementwise scale, both axes parallel, lane-dense output tiles
    scale_bytes = 4 * tile_bytes + 4 * C * 4
    out_flat = pl.pallas_call(
        _scale_kernel,
        out_shape=jax.ShapeDtypeStruct((N, C, HW), x.dtype),
        grid_spec=pltpu.PrefetchScalarGridSpec(
            num_scalar_prefetch=0,
            grid=(N, n_hw),
            in_specs=[
                pl.BlockSpec((pl.Squeezed(), C, thw), lambda n, k: (n, 0, k)),
                pl.BlockSpec((pl.Squeezed(), C, 1), lambda n, k: (n, 0, 0)),
            ],
            out_specs=pl.BlockSpec((pl.Squeezed(), C, thw),
                                   lambda n, k: (n, 0, k)),
        ),
        compiler_params=pltpu.CompilerParams(
            dimension_semantics=("parallel", "parallel"),
            vmem_limit_bytes=_vmem_limit(scale_bytes, cap),
        ),
    )(x_flat, att)

    return out_flat.reshape(N, C, H, W)


def se_block_ref(x, weight, bias):
    # Pure-JAX reference mirroring the PyTorch module.
    pooled = jnp.mean(x, axis=(2, 3), keepdims=True)            # (N, C, 1, 1)
    w = weight[:, :, 0, 0]                                       # (C_out, C_in)
    logits = jnp.einsum('ncij,oc->noij', pooled, w) + bias[None, :, None, None]
    att = jax.nn.sigmoid(logits)
    return x * att


if __name__ == "__main__":
    key = jax.random.PRNGKey(0)
    kx, kw, kb = jax.random.split(key, 3)

    N, C, H, W = 2, 4, 16, 16
    x = jax.random.normal(kx, (N, C, H, W), dtype=jnp.float32)
    # Deterministic synthetic parameters (shapes from nn.Conv2d(c, c, 1)).
    weight = jax.random.normal(kw, (C, C, 1, 1), dtype=jnp.float32) * 0.1
    bias = jax.random.normal(kb, (C,), dtype=jnp.float32) * 0.1

    out = se_block(x, weight, bias)
    out = jax.block_until_ready(out)

    ref = se_block_ref(x, weight, bias)
    assert out.shape == (N, C, H, W)
    assert jnp.allclose(out, ref, atol=1e-5, rtol=1e-5)
    print("KERNEL_OK")
</pallas_src>

<mosaic_0001>
module attributes {stable_mosaic.version = 11 : i64} {
  func.func @fused_kernel(%arg0: i32, %arg1: memref<1x4x256xf32, #tpu.memory_space<vmem>>, %arg2: memref<4x4xf32, #tpu.memory_space<vmem>>, %arg3: memref<4x1xf32, #tpu.memory_space<vmem>>, %arg4: memref<1x4x256xf32, #tpu.memory_space<vmem>>) attributes {dimension_semantics = [#tpu.dimension_semantics<parallel>], iteration_bounds = array<i64: 2>, scalar_prefetch = 0 : i64, scratch_operands = 0 : i64, tpu.core_type = #tpu.core_type<tc>, window_params = [{transform_indices = @transform_0, window_bounds = array<i64: 1, 4, 256>}, {pipeline_mode = #tpu.pipeline_mode<synchronous>, transform_indices = @transform_1, window_bounds = array<i64: 4, 4>}, {pipeline_mode = #tpu.pipeline_mode<synchronous>, transform_indices = @transform_2, window_bounds = array<i64: 4, 1>}, {transform_indices = @transform_3, window_bounds = array<i64: 1, 4, 256>}]} {
    %c0 = arith.constant 0 : index
    %c0_0 = arith.constant 0 : index
    %c0_1 = arith.constant 0 : index
    %0 = vector.load %arg1[%c0, %c0_0, %c0_1] : memref<1x4x256xf32, #tpu.memory_space<vmem>>, vector<1x4x256xf32>
    %1 = vector.shape_cast %0 : vector<1x4x256xf32> to vector<4x256xf32>
    %cst = arith.constant dense<0.000000e+00> : vector<4xf32>
    %2 = vector.multi_reduction <add>, %1, %cst [1] : vector<4x256xf32> to vector<4xf32>
    %3 = vector.shape_cast %2 : vector<4xf32> to vector<4x1xf32>
    %cst_2 = arith.constant 3.906250e-03 : f32
    %4 = vector.broadcast %cst_2 : f32 to vector<4x1xf32>
    %5 = arith.mulf %3, %4 : vector<4x1xf32>
    %c0_3 = arith.constant 0 : index
    %c0_4 = arith.constant 0 : index
    %6 = vector.load %arg2[%c0_3, %c0_4] : memref<4x4xf32, #tpu.memory_space<vmem>>, vector<4x4xf32>
    %cst_5 = arith.constant dense<0.000000e+00> : vector<4x1xf32>
    %7 = tpu.matmul %6, %5, %cst_5 {dimension_numbers = #tpu.dot_dimension_numbers<[1], [0], [0], [1], [0, 0, 1, 1], [], []>} : vector<4x4xf32>, vector<4x1xf32>, vector<4x1xf32> -> vector<4x1xf32>
    %c0_6 = arith.constant 0 : index
    %c0_7 = arith.constant 0 : index
    %8 = vector.load %arg3[%c0_6, %c0_7] : memref<4x1xf32, #tpu.memory_space<vmem>>, vector<4x1xf32>
    %9 = arith.addf %7, %8 : vector<4x1xf32>
    %10 = arith.negf %9 : vector<4x1xf32>
    %11 = math.exp %10 : vector<4x1xf32>
    %cst_8 = arith.constant 1.000000e+00 : f32
    %12 = vector.broadcast %cst_8 : f32 to vector<4x1xf32>
    %13 = arith.addf %12, %11 : vector<4x1xf32>
    %14 = arith.divf %12, %13 : vector<4x1xf32>
    %15 = vector.broadcast %14 : vector<4x1xf32> to vector<4x256xf32>
    %16 = arith.mulf %1, %15 : vector<4x256xf32>
    %c0_9 = arith.constant 0 : index
    %c0_10 = arith.constant 0 : index
    %c0_11 = arith.constant 0 : index
    %17 = vector.load %arg4[%c0_9, %c0_10, %c0_11] : memref<1x4x256xf32, #tpu.memory_space<vmem>>, vector<1x4x256xf32>
    %18 = vector.shape_cast %17 : vector<1x4x256xf32> to vector<4x256xf32>
    %19 = vector.shape_cast %16 : vector<4x256xf32> to vector<1x4x256xf32>
    tpu.vector_store %arg4[%c0_9, %c0_10, %c0_11], %19 {strides = array<i32>} : memref<1x4x256xf32, #tpu.memory_space<vmem>>, vector<1x4x256xf32>,
    return
  }
  func.func @transform_0(%arg0: i32) -> (i32, i32, i32) {
    %c0_i32 = arith.constant 0 : i32
    %c0_i32_0 = arith.constant 0 : i32
    %c0_i32_1 = arith.constant 0 : i32
    return %arg0, %c0_i32, %c0_i32_0 : i32, i32, i32
  }
  func.func @transform_1(%arg0: i32) -> (i32, i32) {
    %c0_i32 = arith.constant 0 : i32
    %c0_i32_0 = arith.constant 0 : i32
    %c0_i32_1 = arith.constant 0 : i32
    return %c0_i32, %c0_i32_0 : i32, i32
  }
  func.func @transform_2(%arg0: i32) -> (i32, i32) {
    %c0_i32 = arith.constant 0 : i32
    %c0_i32_0 = arith.constant 0 : i32
    %c0_i32_1 = arith.constant 0 : i32
    return %c0_i32, %c0_i32_0 : i32, i32
  }
  func.func @transform_3(%arg0: i32) -> (i32, i32, i32) {
    %c0_i32 = arith.constant 0 : i32
    %c0_i32_0 = arith.constant 0 : i32
    %c0_i32_1 = arith.constant 0 : i32
    return %arg0, %c0_i32, %c0_i32_0 : i32, i32, i32
  }
}

</mosaic_0001>

<bundles_post_ra>
// kernel: tpu_custom_call.1
= control target key start
LH: loop header
LB: loop body
LE: loop exit
PB: predicated region body
PF: predicated region fallthrough
CT: control target
= control target key end

     0   :  { %8 = vsyncpa [#allocation3], 0  ;;  %s759_s0 = inlined_call_operand.hbm [shape: f32[2,4,256], index: 0, kind: input, shape index: {}]   ;;  %s760_s1 = inlined_call_operand.vmem [shape: f32[4,4], index: 1, kind: input, shape index: {}]   ;;  %s761_s2 = inlined_call_operand.vmem [shape: f32[4,1], index: 2, kind: input, shape index: {}]   ;;  %s762_s3 = inlined_call_operand.hbm [shape: f32[2,4,256], index: 3, kind: output, shape index: {}]  }
   0x1   :  { %10 = vsyncpa [#allocation3 + $0x1], 0 }
   0x2   :  { %11 = vsyncpa [#allocation4], 0 }
   0x3   :  { %13 = vsyncpa [#allocation4 + $0x1], 0  ;;  %s588_s12 = smov 0   ;;  %s590_s13 = smov 0  }
   0x4   :  { %s592_s14 = smov 0   ;;  %s594_s15 = smov 0  }
   0x5 LB: > { %s609_s16 = sadd.s32 4294967295, %s560_s15   ;;  %s382_s17 = sadd.s32 4294967294, %s560_s15   ;;  %s560_s15 = sphi %s594_s15, %s777_s15   ;;  %s556_s14 = sphi %s592_s14, %s776_s14   ;;  %s552_s13 = sphi %s590_s13, %s775_s13   ;;  %s548_s12 = sphi %s588_s12, %s774_s12  }
   0x6   : > { %s613_s18 = sadd.s32 1, %s560_s15   ;;  %s26_s19 = sadd.s32 1, %s556_s14 }
   0x7   : > { %s23_s20 = ssub.s32 %s560_s15, %s613_s18  ;;  %p33_p0 = scmp.ne.s32.totalorder %s556_s14, %s552_s13 }
   0x8   : > { %p24_p1 = scmp.eq.s32.totalorder %s23_s20, 0  ;;  %p34_p2 = scmp.eq.s32.totalorder %s560_s15, 0 }
   0x9   : > { %p39_p3 = scmp.ne.s32.totalorder %s552_s13, %s548_s12  ;;  %p40_p4 = scmp.eq.s32.totalorder %s609_s16, 0 }
   0xa   : > { %s625_s21 = scalar_select %p24_p1, %s556_s14, %s26_s19  }
   0xb   : > { %p627_p5 = por %p34_p2, %p33_p0  ;;  %p631_p6 = por %p40_p4, %p39_p3 }
   0xc   : > { %p105_p7 = scmp.eq.s32.totalorder %s609_s16, 1  ;;  %p111_p8 = scmp.eq.s32.totalorder %s382_s17, 1 }
   0xd   : > { %p420_p10 = scmp.lt.s32.totalorder %s560_s15, 2  ;;  %s137_s26 = sand.u32 1, %s556_s14  }
   0xe   : > { %p638_p11 = por %p105_p7, %p33_p0  ;;  %p642_p12 = por %p111_p8, %p39_p3 }
   0xf   : > { %s399_s27 = sshll.u32 %s560_s15, 7  ;;  %s385_s28 = sshll.u32 %s137_s26, 3 }
  0x10   : > { %s766_s24 = scalar_select %p638_p11, 1, 0 }
  0x11   : > { %s767_s25 = scalar_select %p642_p12, 1, 0 }
  0x12   : > { %s651_s4 = scalar_lea.hbm %s759_s0, %s399_s27  ;;  %s141_s5 = scalar_lea.vmem [#allocation2], %s385_s28 }
  0x13   : > { %s149_s6 = sshll.u32 %s141_s5, 4  ;;  %p655_p13 = pnand %p420_p10, %p627_p5  ;;  %s659_s6 = int_to_ptr.vmem [resolvable:$true] %s149_s6 }
  0x14   : > { %s138_s8 = scalar_lea.sflag [#allocation3], %s137_s26  ;;  %s464_s9 = scalar_lea.hbm %s651_s4, 128 }
  0x15   : > { %p465_p2 = scmp.ne.s32.totalorder %s651_s4, %s464_s9  ;;  %p466_p3 = pneg %p655_p13 }
  0x16   : > { %s469_s17 = scalar_lea.hbm %s759_s0, 256  ;;  %p470_p5 = scmp.lt.u32.totalorder %s651_s4, %s759_s0 }
  0x17   : > { %p467_p4 = pnand %p466_p3, %p465_p2  ;;  %p471_p8 = scmp.lt.u32.totalorder %s469_s17, %s464_s9 }
  0x18   : > { %p473_p9 = scmp.lt.u32.totalorder %s464_s9, %s651_s4 }
  0x19   : > { %p468_p7 = pneg %p467_p4  ;;  %p472_p10 = por %p471_p8, %p470_p5 }
  0x1b   : > { %p474_p0 = por %p473_p9, %p472_p10 }
  0x1d   : > { %p475_p1 = pnand %p474_p0, %p468_p7 }
  0x1f   : > { %478 = shalt.err (!%p475_p1)
}
  0x20   : > { %s479_s22 = scalar_lea.vmem %s659_s6, 128  ;;  %s562_s26 = smov [#allocation2]  }
  0x21   : > { %p480_p2 = scmp.ne.s32.totalorder %s659_s6, %s479_s22  ;;  %s484_s27 = sshll.u32 %s562_s26, 4  ;;  %s485_s27 = int_to_ptr.vmem [resolvable:$false] %s484_s27 }
  0x22   : > { %s486_s28 = scalar_lea.vmem %s485_s27, 256  ;;  %p487_p11 = scmp.lt.s32.totalorder %s659_s6, %s485_s27 }
  0x23   : > { %p482_p4 = pnand %p480_p2, %p466_p3  ;;  %p488_p5 = scmp.lt.s32.totalorder %s486_s28, %s479_s22 }
  0x25   : > { %p483_p12 = pneg %p482_p4  ;;  %p489_p8 = por %p488_p5, %p487_p11 }
  0x27   : > { %p490_p9 = pnand %p489_p8, %p483_p12 }
  0x29   : > { %493 = shalt.err (!%p490_p9)
}
  0x2a   : > { %415 = dma.hbm_to_vmem [thread:$0]  (!%p655_p13), %s651_s4, 128, %s659_s6, %s138_s8  }
  0x2b   : > { %p769_p0 = scmp.lt.s32.totalorder %s560_s15, 3  ;;  %p770_p1 = scmp.ge.s32.totalorder %s560_s15, 1 }
  0x2d   : > { %p155_p3 = pnand %p770_p1, %p769_p0 }
  0x2e   : > { %s693_s29 = sand.u32 (!%p155_p3), 1, %s552_s13  }
  0x2f   : > { %158 = sbr.rel (%p155_p3) target bundleno = 592 (0x250), region = 32  ;;  %s389_s30 = sshll.u32 (!%p155_p3), %s693_s29, 3 }
  0x30   : > { %s161_s5 = scalar_lea.sflag (!%p155_p3), [#allocation3], %s693_s29  ;;  %s164_s7 = scalar_lea.vmem (!%p155_p3), [#allocation2], %s389_s30 }
  0x36   : > { %539 = dma.done.wait (%p631_p6), %s161_s5, 128  }
  0x37   : > { %541 = vsyncadd (%p631_p6), %s161_s5, 4294967168  ;;  %vm191_vm0 = vcmask 1043456   ;;  %v187_v0 = vld [vmem:[%s164_s7] sm:$0xff]  ;;  %v563_v5 = vmov 0.0   ;;  %vm564_vm1 = vmmov 0   ;;  %vm200_vm2 = vcmask 31744  }
  0x38   : > { %v189_v1 = vcombine.high %v187_v0, %v187_v0  ;;  %v192_v2 = vsel %vm191_vm0, %v187_v0, 0.0  ;;  %403 = vmatprep.subr.mxu0 %v563_v5  ;;  %405 = vmatprep.mubr.msk.f32.mxu0 %vm564_vm1, %v563_v5  ;;  %v198_v8 = vld [vmem:[%s760_s1] sm:$0xf]  ;;  %v565_v9 = vmov 0   ;;  %v566_v18 = vmov 839922192  }
  0x39   : > { %458 = vset.pattern.permute.xlu0 %v565_v9  ;;  %v199_v10 = vld [vmem:[%s761_s2] sm:$0xf]  ;;  %v288_v19 = vunpack.c.l.s4 %v566_v18  ;;  %v290_v20 = vlaneseq  ;;  %s400_s9 = sshll.u32 %s609_s16, 7  ;;  %s186_s10 = scalar_lea.vmem [#allocation5], %s389_s30 }
  0x3a   : > { %v193_v3 = vsel %vm191_vm0, %v189_v1, 0.0  ;;  %s312_s11 = sshll.u32 %s186_s10, 4  ;;  %s715_s20 = scalar_lea.hbm %s762_s3, %s400_s9  ;;  %s717_s11 = int_to_ptr.vmem [resolvable:$true] %s312_s11 }
  0x3b   : > { %v194_v4 = vadd.f32 %v193_v3, %v192_v2  ;;  %v289_v21 = vunpack.c.0.s8 %v288_v19  ;;  %v291_v22 = vshrl.u32 %v290_v20, 7  ;;  %s298_s22 = scalar_lea.sflag [#allocation4], %s693_s29  ;;  %s494_s26 = scalar_lea.vmem %s717_s11, 128 }
  0x3c   : > { %p495_p6 = scmp.ne.s32.totalorder %s717_s11, %s494_s26  ;;  %p771_p11 = scmp.ne.s32.totalorder %s766_s24, 0 }
  0x3d   : > { %195 = vadd.xlane.f32.xlu0 %v194_v4  ;;  %v292_v23 = vsub.s32 %v289_v21, %v291_v22  ;;  %s567_s16 = smov [#allocation5]  }
  0x3e   : > { %p496_p12 = pnand %p495_p6, %p771_p11  ;;  %s498_s27 = sshll.u32 %s567_s16, 4  ;;  %s499_s27 = int_to_ptr.vmem [resolvable:$false] %s498_s27 }
  0x3f   : > { %s500_s28 = scalar_lea.vmem %s499_s27, 256  ;;  %p501_p7 = scmp.lt.s32.totalorder %s717_s11, %s499_s27 }
  0x40   : > { %p497_p13 = pneg %p496_p12  ;;  %p502_p10 = scmp.lt.s32.totalorder %s500_s28, %s494_s26 }
  0x42   : > { %p503_p2 = por %p502_p10, %p501_p7 }
  0x44   : > { %p504_p4 = pnand %p503_p2, %p497_p13 }
  0xca   : > { %v196_v6 = vpop.xlane.xlu0 %195 }
  0xcb   : > { %v197_v7 = vmul.f32 0.00390625, %v196_v6 }
  0xcd   : > { %404 = vmatpush3.msk.msra.mxu0 %vm191_vm0, %v197_v7 }
  0xce   : > { %406 = vmatmul.mubr.msk.f32.vlgmr.msra.gmra.mrb[0].mxu0 %vm200_vm2, %v198_v8 }
 0x1a1   : > { %v273_v11 = vpop.f32.mrb[0].mxu0 }
 0x1a2   : > { %v274_v12 = vadd.f32 %v273_v11, %v199_v10  ;;  %v407_v13 = vpop.f32.mrb[1].mxu0 }
 0x1a4   : > { %v393_v14 = vmul.f32 -1.442695, %v274_v12 }
 0x1a6   : > { %460 = vpow2.f32 %v393_v14 }
 0x1b0   : > { %v461_v15 = vpop.eup %460 }
 0x1b1   : > { %v280_v16 = vadd.f32 1.0, %v461_v15 }
 0x1b3   : > { %462 = vrcp.f32 %v280_v16 }
 0x1bd   : > { %v463_v17 = vpop.eup %462 }
 0x1be   : > { %285 = vperm.xlu0 %458, %v463_v17  }
 0x23d   : > { %v286_v24 = vpop.permute.xlu0 %285 }
 0x23e   : > { %v293_v25 = vrot.slane %v286_v24, %v292_v23 }
 0x240   : > { %v295_v26 = vmul.f32 %v293_v25, %v187_v0 }
 0x242   : > { %296 = vst [vmem:[%s186_s10] sm:$0xff] %v295_v26 }
 0x243   : > { %507 = shalt.err (!%p504_p4)
}
 0x244   : > { %s508_s29 = scalar_lea.hbm %s715_s20, 128  ;;  %s512_s7 = scalar_lea.hbm %s762_s3, 256 }
 0x245   : > { %p509_p5 = scmp.ne.s32.totalorder %s715_s20, %s508_s29  ;;  %p513_p0 = scmp.lt.u32.totalorder %s715_s20, %s762_s3 }
 0x246   : > { %p514_p1 = scmp.lt.u32.totalorder %s512_s7, %s508_s29  ;;  %p516_p6 = scmp.lt.u32.totalorder %s508_s29, %s715_s20 }
 0x247   : > { %p510_p8 = pnand %p509_p5, %p771_p11 }
 0x248   : > { %p515_p3 = por %p514_p1, %p513_p0 }
 0x249   : > { %p511_p9 = pneg %p510_p8 }
 0x24a   : > { %p517_p12 = por %p516_p6, %p515_p3 }
 0x24c   : > { %p518_p13 = pnand %p517_p12, %p511_p9 }
 0x24e   : > { %521 = shalt.err (!%p518_p13)
}
 0x24f   : > { %410 = dma.vmem_to_hbm [thread:$0]  (%p771_p11), %s717_s11, 128, %s715_s20, %s298_s22  }
 0x250 PF: > { %s324_s23 = sand.u32 1, %s548_s12   ;;  %p772_p7 = scmp.ne.s32.totalorder %s767_s25, 0 }
 0x251   : > { %p773_p10 = scmp.ge.s32.totalorder %s560_s15, 2  ;;  %s325_s8 = scalar_lea.sflag [#allocation4], %s324_s23 }
 0x253   : > { %p417_p2 = pnand %p773_p10, %p772_p7 }
 0x255   : > { %543 = dma.done.wait (!%p417_p2), %s325_s8, 128  }
 0x256   : > { %545 = vsyncadd (!%p417_p2), %s325_s8, 4294967168  ;;  %p16_p4 = scmp.ge.s32.totalorder %s613_s18, 4   ;;  %s774_s12 = smov %s552_s13 }
 0x257   : > { %s775_s13 = smov %s556_s14  ;;  %s776_s14 = smov %s625_s21 }
 0x258   : > { %s777_s15 = smov %s613_s18  ;;  %18 = sbr.rel (!%p16_p4) target bundleno = 5 (0x5), region = 77 }
 0x25f   :  { %330 = vsyncpa [#allocation3], 1 }
 0x260   :  { %332 = vsyncpa [#allocation3 + $0x1], 1 }
 0x261   :  { %333 = vsyncpa [#allocation4], 1 }
 0x262   :  { %335 = vsyncpa [#allocation4 + $0x1], 1 }

</bundles_post_ra>
